<compile_context>
chip_gen: v7x
topology: tpu7x:2x2x1
jax: 0.10.0
libtpu: 0.0.40
codegen_flags: <defaults>
</compile_context>

<pallas_src>
import math

import jax
import jax.numpy as jnp
from jax.experimental import pallas as pl
from jax.experimental.pallas import tpu as pltpu


_TILE_BYTES = 4 * 1024 * 1024  # ~4 MiB per x tile -> ~16 MiB with double-buffered x + out


def _normalize_cp_kernel(x_ref, scale_ref, bias_ref, o_ref):
    # Pure VPU fused multiply-add; the (1, W) params broadcast over the sublane axis.
    o_ref[...] = x_ref[...] * scale_ref[...] + bias_ref[...]


def _lane_dense_width(dim: int, target: int = 512) -> int:
    """Smallest multiple of both `dim` and 128, widened toward `target` lanes."""
    base = dim * 128 // math.gcd(dim, 128)  # lcm(dim, 128)
    return base * max(1, target // base)


def normalize_cp(x, lows, lengths):
    """x: [batch, dim], lows/lengths: [1, dim]. Returns (x + lows) / lengths * 2 - 1."""
    B, D = x.shape
    dtype = x.dtype

    # Fold the affine transform once (tiny [1, D] arrays, one-time cost):
    #   (x + lows) / lengths * 2 - 1  ==  x * (2 / lengths) + (2 * lows / lengths - 1)
    lengths_f = lengths.astype(jnp.float32)
    lows_f = lows.astype(jnp.float32)
    scale = (2.0 / lengths_f).astype(dtype)                  # (1, D)
    bias = (2.0 * lows_f / lengths_f - 1.0).astype(dtype)    # (1, D)

    # Lane-dense layout: view [B, D] as [rows, W] with W % 128 == 0 (full lane
    # utilization, unmasked stores) and W % D == 0 (tiled params stay aligned).
    W = _lane_dense_width(D)
    itemsize = jnp.dtype(dtype).itemsize
    total = B * D

    rows_needed = pl.cdiv(total, W)
    tb = max(8, (_TILE_BYTES // (W * itemsize)) // 8 * 8)    # rows per tile, multiple of 8
    if tb >= rows_needed:
        tb = rows_needed                                     # single block == full array
        rows = rows_needed
    else:
        rows = pl.cdiv(rows_needed, tb) * tb                 # pad so the grid divides evenly

    padded = rows * W
    x_flat = x.reshape(-1)
    if padded != total:
        x_flat = jnp.pad(x_flat, (0, padded - total))
    x2 = x_flat.reshape(rows, W)

    reps = W // D
    scale_row = jnp.tile(scale, (1, reps))                   # (1, W)
    bias_row = jnp.tile(bias, (1, reps))                     # (1, W)

    out2 = pl.pallas_call(
        _normalize_cp_kernel,
        out_shape=jax.ShapeDtypeStruct((rows, W), dtype),
        grid=(rows // tb,),
        in_specs=[
            pl.BlockSpec((tb, W), lambda i: (i, 0)),         # streamed x tiles
            pl.BlockSpec((1, W), lambda i: (0, 0)),          # scale row (resident)
            pl.BlockSpec((1, W), lambda i: (0, 0)),          # bias row (resident)
        ],
        out_specs=pl.BlockSpec((tb, W), lambda i: (i, 0)),
        compiler_params=pltpu.CompilerParams(
            dimension_semantics=("parallel",),               # shard row tiles across TCs (v7x)
            vmem_limit_bytes=32 * 1024 * 1024,
        ),
    )(x2, scale_row, bias_row)

    if padded != total:
        return out2.reshape(-1)[:total].reshape(B, D)
    return out2.reshape(B, D)


def make_params(sizes):
    """Deterministic parameter construction mirroring NormalizeCP.__init__."""
    lengths = jnp.array([[j - i for i, j in sizes]], dtype=jnp.float32)  # [1, D]
    lows = jnp.array([[i for i, _ in sizes]], dtype=jnp.float32)         # [1, D]
    return lows, lengths


if __name__ == "__main__":
    # sizes define dim_input = len(sizes); pick 4 coordinate ranges.
    sizes = [(0.0, 1.0), (-1.0, 1.0), (0.0, 2.0), (-0.5, 0.5)]
    lows, lengths = make_params(sizes)
    dim = len(sizes)

    key = jax.random.PRNGKey(0)

    # Primary small-shape run (as the module implies: [batch, dim_input]).
    batch = 8
    x = jax.random.uniform(key, (batch, dim), dtype=jnp.float32, minval=-1.0, maxval=2.0)
    out = jax.block_until_ready(normalize_cp(x, lows, lengths))
    ref = (x + lows) / lengths * 2.0 - 1.0
    assert out.shape == x.shape and out.dtype == x.dtype
    assert jnp.allclose(out, ref, atol=1e-5, rtol=1e-5)

    # Secondary check exercising a multi-row lane-dense view (no pad path).
    batch2 = 1024  # 1024 * 4 = 4096 elements = 8 rows of 512 lanes, no padding
    x2 = jax.random.uniform(
        jax.random.PRNGKey(1), (batch2, dim), dtype=jnp.float32, minval=-2.0, maxval=3.0
    )
    out2 = jax.block_until_ready(normalize_cp(x2, lows, lengths))
    ref2 = (x2 + lows) / lengths * 2.0 - 1.0
    assert out2.shape == x2.shape and out2.dtype == x2.dtype
    assert jnp.allclose(out2, ref2, atol=1e-5, rtol=1e-5)

    print("KERNEL_OK")
</pallas_src>

<mosaic_0001>
module attributes {stable_mosaic.version = 11 : i64} {
  func.func @_normalize_cp_kernel(%arg0: i32, %arg1: memref<1x512xf32, #tpu.memory_space<vmem>>, %arg2: memref<1x512xf32, #tpu.memory_space<vmem>>, %arg3: memref<1x512xf32, #tpu.memory_space<vmem>>, %arg4: memref<1x512xf32, #tpu.memory_space<vmem>>) attributes {dimension_semantics = [#tpu.dimension_semantics<parallel>], iteration_bounds = array<i64: 1>, scalar_prefetch = 0 : i64, scratch_operands = 0 : i64, tpu.core_type = #tpu.core_type<tc>, window_params = [{transform_indices = @transform_0, window_bounds = array<i64: 1, 512>}, {pipeline_mode = #tpu.pipeline_mode<synchronous>, transform_indices = @transform_1, window_bounds = array<i64: 1, 512>}, {pipeline_mode = #tpu.pipeline_mode<synchronous>, transform_indices = @transform_2, window_bounds = array<i64: 1, 512>}, {transform_indices = @transform_3, window_bounds = array<i64: 1, 512>}]} {
    %c0 = arith.constant 0 : index
    %c0_0 = arith.constant 0 : index
    %0 = vector.load %arg1[%c0, %c0_0] : memref<1x512xf32, #tpu.memory_space<vmem>>, vector<1x512xf32>
    %c0_1 = arith.constant 0 : index
    %c0_2 = arith.constant 0 : index
    %1 = vector.load %arg2[%c0_1, %c0_2] : memref<1x512xf32, #tpu.memory_space<vmem>>, vector<1x512xf32>
    %2 = arith.mulf %0, %1 : vector<1x512xf32>
    %c0_3 = arith.constant 0 : index
    %c0_4 = arith.constant 0 : index
    %3 = vector.load %arg3[%c0_3, %c0_4] : memref<1x512xf32, #tpu.memory_space<vmem>>, vector<1x512xf32>
    %4 = arith.addf %2, %3 : vector<1x512xf32>
    %c0_5 = arith.constant 0 : index
    %c0_6 = arith.constant 0 : index
    %5 = vector.load %arg4[%c0_5, %c0_6] : memref<1x512xf32, #tpu.memory_space<vmem>>, vector<1x512xf32>
    tpu.vector_store %arg4[%c0_5, %c0_6], %4 {strides = array<i32>} : memref<1x512xf32, #tpu.memory_space<vmem>>, vector<1x512xf32>,
    return
  }
  func.func @transform_0(%arg0: i32) -> (i32, i32) {
    %c0_i32 = arith.constant 0 : i32
    %c0_i32_0 = arith.constant 0 : i32
    return %arg0, %c0_i32 : i32, i32
  }
  func.func @transform_1(%arg0: i32) -> (i32, i32) {
    %c0_i32 = arith.constant 0 : i32
    %c0_i32_0 = arith.constant 0 : i32
    %c0_i32_1 = arith.constant 0 : i32
    return %c0_i32, %c0_i32_0 : i32, i32
  }
  func.func @transform_2(%arg0: i32) -> (i32, i32) {
    %c0_i32 = arith.constant 0 : i32
    %c0_i32_0 = arith.constant 0 : i32
    %c0_i32_1 = arith.constant 0 : i32
    return %c0_i32, %c0_i32_0 : i32, i32
  }
  func.func @transform_3(%arg0: i32) -> (i32, i32) {
    %c0_i32 = arith.constant 0 : i32
    %c0_i32_0 = arith.constant 0 : i32
    return %arg0, %c0_i32 : i32, i32
  }
}

</mosaic_0001>

<bundles_post_ra>
// kernel: tpu_custom_call.1
= control target key start
LH: loop header
LB: loop body
LE: loop exit
PB: predicated region body
PF: predicated region fallthrough
CT: control target
= control target key end

     0   :  { %8 = vsyncpa [#allocation3], 0  ;;  %s202_s0 = inlined_call_operand.hbm [shape: f32[1,512], index: 0, kind: input, shape index: {}]   ;;  %s203_s1 = inlined_call_operand.hbm [shape: f32[1,512], index: 1, kind: input, shape index: {}]   ;;  %s204_s2 = inlined_call_operand.vmem [shape: f32[1,512], index: 2, kind: input, shape index: {}]   ;;  %s205_s3 = inlined_call_operand.hbm [shape: f32[1,512], index: 3, kind: output, shape index: {}]  }
   0x1   :  { %9 = vsyncpa [#allocation6], 0 }
   0x2   :  { %10 = vsyncpa [#allocation4], 0  ;;  %s140_s12 = smov [#allocation2]   ;;  %s141_s14 = smov [#allocation5]  }
   0x3   :  { %s17_s13 = sshll.u32 %s140_s12, 4  ;;  %s27_s15 = sshll.u32 %s141_s14, 4  ;;  %s18_s13 = int_to_ptr.vmem [resolvable:$true] %s17_s13  ;;  %s28_s15 = int_to_ptr.vmem [resolvable:$true] %s27_s15 }
   0x4   :  { %s68_s18 = scalar_lea.hbm %s202_s0, 64 }
   0x5   :  { %p69_p0 = scmp.ne.s32.totalorder %s202_s0, %s68_s18  ;;  %p72_p1 = scmp.lt.u32.totalorder %s68_s18, %s202_s0 }
   0x7   :  { %p74_p2 = pnand %p72_p1, %p69_p0 }
   0x9   :  { %77 = shalt.err (!%p74_p2)
}
   0xa   :  { %s78_s23 = scalar_lea.vmem %s18_s13, 64  ;;  %p83_p4 = scmp.lt.s32.totalorder %s18_s13, %s18_s13 }
   0xb   :  { %p79_p3 = scmp.ne.s32.totalorder %s18_s13, %s78_s23  ;;  %p84_p5 = scmp.lt.s32.totalorder %s78_s23, %s78_s23 }
   0xd   :  { %p85_p6 = por %p84_p5, %p83_p4 }
   0xf   :  { %p86_p7 = pnand %p85_p6, %p79_p3 }
  0x11   :  { %89 = shalt.err (!%p86_p7)
}
  0x12   :  { %20 = dma.hbm_to_vmem [thread:$0]  %s202_s0, 64, %s18_s13, [#allocation3]  }
  0x13   :  { %s90_s28 = scalar_lea.hbm %s203_s1, 64 }
  0x14   :  { %p91_p8 = scmp.ne.s32.totalorder %s203_s1, %s90_s28  ;;  %p94_p9 = scmp.lt.u32.totalorder %s90_s28, %s203_s1 }
  0x16   :  { %p96_p10 = pnand %p94_p9, %p91_p8 }
  0x18   :  { %99 = shalt.err (!%p96_p10)
}
  0x19   :  { %s100_s6 = scalar_lea.vmem %s28_s15, 64  ;;  %p105_p12 = scmp.lt.s32.totalorder %s28_s15, %s28_s15 }
  0x1a   :  { %p101_p11 = scmp.ne.s32.totalorder %s28_s15, %s100_s6  ;;  %p106_p13 = scmp.lt.s32.totalorder %s100_s6, %s100_s6 }
  0x1c   :  { %p107_p0 = por %p106_p13, %p105_p12 }
  0x1e   :  { %p108_p1 = pnand %p107_p0, %p101_p11 }
  0x20   :  { %111 = shalt.err (!%p108_p1)
}
  0x21   :  { %30 = dma.hbm_to_vmem [thread:$0]  %s203_s1, 64, %s28_s15, [#allocation6]  }
  0x22   :  { %134 = dma.done.wait [#allocation3], 64  }
  0x23   :  { %135 = vsyncadd [#allocation3], 4294967232 }
  0x24   :  { %136 = dma.done.wait [#allocation6], 64  }
  0x25   :  { %137 = vsyncadd [#allocation6], 4294967232  ;;  %v44_v0 = vlaneseq  ;;  %s142_s8 = smov [#allocation7]   ;;  %v39_v1 = vld [vmem:[#allocation2] sm:$0xf] }
  0x26   :  { %s55_s9 = sshll.u32 %s142_s8, 4  ;;  %v40_v2 = vld [vmem:[#allocation5] sm:$0xf]  ;;  %v42_v3 = vld [vmem:[%s204_s2] sm:$0xf]  ;;  %s56_s9 = int_to_ptr.vmem [resolvable:$true] %s55_s9 }
  0x27   :  { %v41_v4 = vmul.f32 %v40_v2, %v39_v1  ;;  %vm46_vm0 = vcmp.lt.s32.totalorder %v44_v0, 512  ;;  %s112_s12 = scalar_lea.vmem %s56_s9, 64  ;;  %p117_p3 = scmp.lt.s32.totalorder %s56_s9, %s56_s9 }
  0x28   :  { %p113_p2 = scmp.ne.s32.totalorder %s56_s9, %s112_s12  ;;  %p118_p4 = scmp.lt.s32.totalorder %s112_s12, %s112_s12 }
  0x29   :  { %v43_v5 = vadd.f32 %v42_v3, %v41_v4 }
  0x2a   :  { %p119_p5 = por %p118_p4, %p117_p3 }
  0x2b   :  { %48 = vst.msk [vmem:[#allocation7] sm:$0xf] %vm46_vm0, %v43_v5 }
  0x2c   :  { %p120_p6 = pnand %p119_p5, %p113_p2 }
  0x2e   :  { %123 = shalt.err (!%p120_p6)
}
  0x2f   :  { %s124_s14 = scalar_lea.hbm %s205_s3, 64 }
  0x30   :  { %p125_p7 = scmp.ne.s32.totalorder %s205_s3, %s124_s14  ;;  %p128_p8 = scmp.lt.u32.totalorder %s124_s14, %s205_s3 }
  0x32   :  { %p130_p9 = pnand %p128_p8, %p125_p7 }
  0x34   :  { %133 = shalt.err (!%p130_p9)
}
  0x35   :  { %58 = dma.vmem_to_hbm [thread:$0]  %s56_s9, 64, %s205_s3, [#allocation4]  }
  0x36   :  { %138 = dma.done.wait [#allocation4], 64  }
  0x37   :  { %139 = vsyncadd [#allocation4], 4294967232 }
  0x38   :  { %62 = vsyncpa [#allocation3], 1 }
  0x39   :  { %63 = vsyncpa [#allocation6], 1 }
  0x3a   :  { %64 = vsyncpa [#allocation4], 1 }

</bundles_post_ra>
